<compile_context>
chip_gen: v7x
topology: tpu7x:2x2x1
jax: 0.10.0
libtpu: 0.0.40
codegen_flags: <defaults>
</compile_context>

<pallas_src>
import functools
import math

import jax
import jax.numpy as jnp
from jax.experimental import pallas as pl
from jax.experimental.pallas import tpu as pltpu


def _round_up(x, m):
    return -(-x // m) * m


def _sublane_pack(itemsize):
    # sublane packing: 8 rows for 4-byte dtypes, 16 for bf16, 32 for int8/fp8
    return max(8, 32 // max(itemsize, 1))


@functools.lru_cache(maxsize=None)
def _budgets():
    """(real-bytes block target, vmem_limit_bytes), tuned per TPU generation."""
    vmem_phys = 64 * 1024 * 1024            # conservative default (v7x-sized)
    try:
        info = pltpu.get_tpu_info()
        vmem_phys = int(getattr(info, "vmem_capacity_bytes", vmem_phys))
    except Exception:
        pass
    if vmem_phys >= 100 * 1024 * 1024:      # v5e / v6e: 128 MiB physical VMEM
        return 12 * 1024 * 1024, 64 * 1024 * 1024
    return 8 * 1024 * 1024, 48 * 1024 * 1024   # v7x: 64 MiB physical VMEM


def _legal_blocks(dim, tile):
    """Divisors of `dim` that are legal block sizes for a tiled (sublane/lane)
    axis: multiples of `tile`, or the full dim."""
    return [d for d in range(1, dim + 1)
            if dim % d == 0 and (d % tile == 0 or d == dim)]


def _choose_tiles(N, C, H, W, itemsize, target_bytes, vmem_block_cap):
    """Pick (nb, cb, hb) for the (nb, cb, hb, W) input block.

    Budget by real bytes (keep DMA per grid step >> per-step overhead) while a
    dtype-aware padded estimate enforces the per-block VMEM cap; prefer >=2
    blocks on the parallel (N, C) axes so both v7x TensorCores stay busy.
    """
    pack = _sublane_pack(itemsize)
    w_pad = _round_up(W, 128)

    def real_bytes(nb, cb, hb):
        return nb * cb * hb * W * itemsize

    def padded_bytes(nb, cb, hb):
        return nb * cb * _round_up(hb, pack) * w_pad * itemsize

    nb_opts = _legal_blocks(N, 8)      # output sublane axis
    cb_opts = _legal_blocks(C, 128)    # output lane axis
    hb_opts = _legal_blocks(H, 8)      # input sublane axis

    best_key, best = None, None
    for hb in hb_opts:
        for cb in cb_opts:
            for nb in nb_opts:
                pad = padded_bytes(nb, cb, hb)
                if pad > vmem_block_cap:
                    continue
                real = real_bytes(nb, cb, hb)
                n_parallel = (N // nb) * (C // cb)
                steps = n_parallel * (H // hb)
                key = (
                    min(real, target_bytes),       # fill the real-bytes target first
                    1 if n_parallel >= 2 else 0,   # keep both v7x TCs fed if possible
                    -pad,                          # then minimize VMEM padding
                    -steps,                        # then minimize grid steps
                )
                if best_key is None or key > best_key:
                    best_key, best = key, (nb, cb, hb)

    if best is None:
        # Even the minimal legal block overflows the cap (huge W); take the
        # smallest legal block and let the explicit vmem limit arbitrate.
        # TODO(synk): add W (lane) tiling with a running-sum accumulator for
        # pathological W*C shapes where a single (1, 1, 8, W) slab cannot fit.
        best = (nb_opts[0], cb_opts[0], hb_opts[0])
    return best


def _mean_max_kernel(x_ref, o_ref, acc_ref, *, inv_w):
    # x_ref:   (nb, cb, hb, W)  native-NCHW input tile
    # o_ref:   (nb, cb)         output tile, resident across the H grid axis
    # acc_ref: (nb, cb) f32     running max of the per-row W-sums
    h = pl.program_id(2)

    @pl.when(h == 0)
    def _init():
        acc_ref[...] = jnp.full_like(acc_ref, -jnp.inf)

    # Sum over W (lane axis, XLU) with f32 accumulation, then max over the hb rows.
    s = jnp.sum(x_ref[...], axis=-1, dtype=jnp.float32)          # (nb, cb, hb)
    acc_ref[...] = jnp.maximum(acc_ref[...], jnp.max(s, axis=-1))

    @pl.when(h == pl.num_programs(2) - 1)
    def _finalize():
        # One 1/W scale turns the running max-of-sums into max-of-means.
        o_ref[...] = (acc_ref[...] * inv_w).astype(o_ref.dtype)


def _mean_max_single_kernel(x_ref, o_ref, *, inv_w):
    # Whole (N, C, H, W) input resident in VMEM: no grid, no accumulator.
    s = jnp.sum(x_ref[...], axis=-1, dtype=jnp.float32)          # (N, C, H)
    o_ref[...] = (jnp.max(s, axis=-1) * inv_w).astype(o_ref.dtype)


def _mean_and_max_4d(x):
    N, C, H, W = x.shape
    itemsize = x.dtype.itemsize
    target_bytes, vmem_limit = _budgets()
    vmem_block_cap = vmem_limit // 3        # double-buffered input + headroom
    inv_w = 1.0 / W
    pack = _sublane_pack(itemsize)

    # Tiny-input fast path: whole padded array fits in a single VMEM block.
    whole_padded = N * C * _round_up(H, pack) * _round_up(W, 128) * itemsize
    if whole_padded <= vmem_block_cap:
        return pl.pallas_call(
            functools.partial(_mean_max_single_kernel, inv_w=inv_w),
            out_shape=jax.ShapeDtypeStruct((N, C), x.dtype),
            compiler_params=pltpu.CompilerParams(vmem_limit_bytes=vmem_limit),
        )(x)

    nb, cb, hb = _choose_tiles(N, C, H, W, itemsize, target_bytes, vmem_block_cap)
    grid = (N // nb, C // cb, H // hb)      # H (reduction) axis last

    return pl.pallas_call(
        functools.partial(_mean_max_kernel, inv_w=inv_w),
        out_shape=jax.ShapeDtypeStruct((N, C), x.dtype),
        grid_spec=pltpu.PrefetchScalarGridSpec(
            num_scalar_prefetch=0,
            grid=grid,
            in_specs=[pl.BlockSpec((nb, cb, hb, W), lambda n, c, h: (n, c, h, 0))],
            out_specs=pl.BlockSpec((nb, cb), lambda n, c, h: (n, c)),
            scratch_shapes=[pltpu.VMEM((nb, cb), jnp.float32)],
        ),
        compiler_params=pltpu.CompilerParams(
            dimension_semantics=("parallel", "parallel", "arbitrary"),
            vmem_limit_bytes=vmem_limit,
        ),
    )(x)


@jax.jit
def mean_and_max(x):
    """Pallas equivalent of nnMeanAndMax.forward: max over dim -2 of the mean over dim -1."""
    if x.ndim < 2:
        raise ValueError("nnMeanAndMax needs an input with at least 2 dimensions")
    if x.ndim == 4:
        return _mean_and_max_4d(x)
    # Generic rank: collapse the kept leading dims into one "channel" axis
    # (row-major collapse is a free metadata reshape in XLA, no HBM traffic).
    lead = x.shape[:-2]
    b = math.prod(lead) if lead else 1
    y = _mean_and_max_4d(x.reshape(1, b, x.shape[-2], x.shape[-1]))
    return y.reshape(lead)


if __name__ == "__main__":
    key = jax.random.PRNGKey(0)
    # small NCHW input consistent with the module's conv-style usage
    x = jax.random.normal(key, (2, 4, 16, 16), dtype=jnp.float32)

    out = jax.block_until_ready(mean_and_max(x))

    # pure-JAX reference of the exact PyTorch semantics
    ref = jnp.max(jnp.mean(x, axis=-1), axis=-1)
    assert out.shape == ref.shape == (2, 4)
    assert jnp.allclose(out, ref, atol=1e-5, rtol=1e-5), float(jnp.max(jnp.abs(out - ref)))

    print("KERNEL_OK")
</pallas_src>

<mosaic_0001>
module attributes {stable_mosaic.version = 11 : i64} {
  func.func @_mean_max_single_kernel(%arg0: memref<2x4x16x16xf32, #tpu.memory_space<vmem>>, %arg1: memref<2x4xf32, #tpu.memory_space<vmem>>) attributes {dimension_semantics = [], scalar_prefetch = 0 : i64, scratch_operands = 0 : i64, tpu.core_type = #tpu.core_type<tc>} {
    %c0 = arith.constant 0 : index
    %c0_0 = arith.constant 0 : index
    %c0_1 = arith.constant 0 : index
    %c0_2 = arith.constant 0 : index
    %0 = vector.load %arg0[%c0, %c0_0, %c0_1, %c0_2] : memref<2x4x16x16xf32, #tpu.memory_space<vmem>>, vector<2x4x16x16xf32>
    %cst = arith.constant dense<0.000000e+00> : vector<2x4x16xf32>
    %1 = vector.multi_reduction <add>, %0, %cst [3] : vector<2x4x16x16xf32> to vector<2x4x16xf32>
    %cst_3 = arith.constant dense<0xFF800000> : vector<2x4xf32>
    %2 = vector.multi_reduction <maximumf>, %1, %cst_3 [2] : vector<2x4x16xf32> to vector<2x4xf32>
    %cst_4 = arith.constant 6.250000e-02 : f32
    %3 = vector.broadcast %cst_4 : f32 to vector<2x4xf32>
    %4 = arith.mulf %2, %3 : vector<2x4xf32>
    %c0_5 = arith.constant 0 : index
    %c0_6 = arith.constant 0 : index
    %5 = vector.load %arg1[%c0_5, %c0_6] : memref<2x4xf32, #tpu.memory_space<vmem>>, vector<2x4xf32>
    tpu.vector_store %arg1[%c0_5, %c0_6], %4 {strides = array<i32>} : memref<2x4xf32, #tpu.memory_space<vmem>>, vector<2x4xf32>,
    return
  }
}

</mosaic_0001>

<bundles_post_ra>
// kernel: mean_and_max.1
= control target key start
LH: loop header
LB: loop body
LE: loop exit
PB: predicated region body
PF: predicated region fallthrough
CT: control target
= control target key end

     0   :  { %6 = vsyncpa [#allocation3], 0  ;;  %s352_s0 = inlined_call_operand.hbm [shape: f32[2,4,16,16], index: 0, kind: input, shape index: {}]   ;;  %s353_s1 = inlined_call_operand.hbm [shape: f32[2,4], index: 1, kind: output, shape index: {}]  }
   0x1   :  { %7 = vsyncpa [#allocation4], 0  ;;  %s281_s6 = smov [#allocation2]   ;;  %s233_s10 = scalar_lea.hbm %s352_s0, 2048 }
   0x2   :  { %s13_s7 = sshll.u32 %s281_s6, 4  ;;  %p234_p0 = scmp.ne.s32.totalorder %s352_s0, %s233_s10  ;;  %s14_s7 = int_to_ptr.vmem [resolvable:$true] %s13_s7 }
   0x3   :  { %p237_p1 = scmp.lt.u32.totalorder %s233_s10, %s352_s0 }
   0x5   :  { %p239_p2 = pnand %p237_p1, %p234_p0 }
   0x7   :  { %242 = shalt.err (!%p239_p2)
}
   0x8   :  { %s243_s15 = scalar_lea.vmem %s14_s7, 2048  ;;  %p248_p4 = scmp.lt.s32.totalorder %s14_s7, %s14_s7 }
   0x9   :  { %p244_p3 = scmp.ne.s32.totalorder %s14_s7, %s243_s15  ;;  %p249_p5 = scmp.lt.s32.totalorder %s243_s15, %s243_s15 }
   0xb   :  { %p250_p6 = por %p249_p5, %p248_p4 }
   0xd   :  { %p251_p7 = pnand %p250_p6, %p244_p3 }
   0xf   :  { %254 = shalt.err (!%p251_p7)
}
  0x10   :  { %s282_s16 = smov 128   ;;  %s283_s17 = smov 8  }
  0x11   :  { %19 = dma.hbm_to_vmem [thread:$0]  %s352_s0, 2048, %s14_s7, [#allocation3], %s282_s16, %s282_s16, %s283_s17  }
  0x12   :  { %277 = dma.done.wait [#allocation3], 2048  }
  0x13   :  { %278 = vsyncadd [#allocation3], 4294965248  ;;  %vm39_vm0 = vcmask 130048   ;;  %v25_v0 = vld [vmem:[#allocation2 + $0x10] sm:$0xff]  ;;  %v23_v1 = vld [vmem:[#allocation2] sm:$0xff]  ;;  %v104_v36 = vlaneseq  ;;  %vm115_vm1 = vcmask 130112  }
  0x14   :  { %v26_v2 = vld [vmem:[#allocation2 + $0x18] sm:$0xff]  ;;  %v46_v3 = vsel %vm39_vm0, %v25_v0, 0.0  ;;  %v40_v4 = vsel %vm39_vm0, %v23_v1, 0.0  ;;  %v24_v5 = vld [vmem:[#allocation2 + $0x8] sm:$0xff]  ;;  %v31_v9 = vld [vmem:[#allocation2 + $0x40] sm:$0xff]  ;;  %vm180_vm2 = vcmask 1041409  }
  0x15   :  { %47 = vadd.xlane.f32.xlu1 %v46_v3  ;;  %41 = vadd.xlane.f32.xlu0 %v40_v4  ;;  %v49_v6 = vsel %vm39_vm0, %v26_v2, 0.0  ;;  %v43_v7 = vsel %vm39_vm0, %v24_v5, 0.0  ;;  %v32_v8 = vld [vmem:[#allocation2 + $0x48] sm:$0xff]  ;;  %v64_v11 = vsel %vm39_vm0, %v31_v9, 0.0  ;;  %v34_v12 = vld [vmem:[#allocation2 + $0x58] sm:$0xff]  ;;  %v33_v13 = vld [vmem:[#allocation2 + $0x50] sm:$0xff] }
  0x16   :  { %v67_v10 = vsel %vm39_vm0, %v32_v8, 0.0  ;;  %v73_v14 = vsel %vm39_vm0, %v34_v12, 0.0  ;;  %v70_v15 = vsel %vm39_vm0, %v33_v13, 0.0  ;;  %v28_v16 = vld [vmem:[#allocation2 + $0x28] sm:$0xff]  ;;  %v27_v17 = vld [vmem:[#allocation2 + $0x20] sm:$0xff]  ;;  %v30_v24 = vld [vmem:[#allocation2 + $0x38] sm:$0xff] }
  0x17   :  { %v55_v18 = vsel %vm39_vm0, %v28_v16, 0.0  ;;  %v52_v19 = vsel %vm39_vm0, %v27_v17, 0.0  ;;  %v36_v20 = vld [vmem:[#allocation2 + $0x68] sm:$0xff]  ;;  %v35_v21 = vld [vmem:[#allocation2 + $0x60] sm:$0xff]  ;;  %v29_v25 = vld [vmem:[#allocation2 + $0x30] sm:$0xff]  ;;  %v61_v26 = vsel %vm39_vm0, %v30_v24, 0.0 }
  0x18   :  { %v79_v22 = vsel %vm39_vm0, %v36_v20, 0.0  ;;  %v76_v23 = vsel %vm39_vm0, %v35_v21, 0.0  ;;  %v58_v27 = vsel %vm39_vm0, %v29_v25, 0.0  ;;  %v38_v28 = vld [vmem:[#allocation2 + $0x78] sm:$0xff]  ;;  %v37_v29 = vld [vmem:[#allocation2 + $0x70] sm:$0xff]  ;;  %v105_v39 = vand.u32 127, %v104_v36 }
  0x19   :  { %50 = vadd.xlane.f32.xlu1 %v49_v6  ;;  %44 = vadd.xlane.f32.xlu0 %v43_v7  ;;  %v85_v30 = vsel %vm39_vm0, %v38_v28, 0.0  ;;  %v82_v31 = vsel %vm39_vm0, %v37_v29, 0.0  ;;  %v107_v43 = vshrl.u32 %v104_v36, 7  ;;  %vm182_vm3 = vcmask 1042434   ;;  %s284_s0 = smov [#allocation5]  }
  0x1a   :  { %v110_v40 = vadd.s32 4294967288, %v105_v39  ;;  %vm184_vm4 = vcmask 1043459   ;;  %vm191_vm5 = vcmask 125952   ;;  %s220_s20 = sshll.u32 %s284_s0, 4  ;;  %vm212_vm6 = vcmask 25600   ;;  %s221_s20 = int_to_ptr.vmem [resolvable:$true] %s220_s20 }
  0x1b   :  { %v108_v47 = vsub.s32 %v105_v39, %v107_v43  ;;  %s255_s21 = scalar_lea.vmem %s221_s20, 32  ;;  %p260_p9 = scmp.lt.s32.totalorder %s221_s20, %s221_s20 }
  0x1c   :  { %v113_v44 = vsub.s32 %v110_v40, %v107_v43  ;;  %p256_p8 = scmp.ne.s32.totalorder %s221_s20, %s255_s21  ;;  %p261_p10 = scmp.lt.s32.totalorder %s255_s21, %s255_s21 }
  0x1d   :  { %68 = vadd.xlane.f32.xlu1 %v67_v10  ;;  %65 = vadd.xlane.f32.xlu0 %v64_v11 }
  0x1e   :  { %p262_p11 = por %p261_p10, %p260_p9 }
  0x20   :  { %p263_p12 = pnand %p262_p11, %p256_p8 }
  0x21   :  { %74 = vadd.xlane.f32.xlu1 %v73_v14  ;;  %71 = vadd.xlane.f32.xlu0 %v70_v15 }
  0x25   :  { %56 = vadd.xlane.f32.xlu1 %v55_v18  ;;  %53 = vadd.xlane.f32.xlu0 %v52_v19 }
  0x29   :  { %80 = vadd.xlane.f32.xlu1 %v79_v22  ;;  %77 = vadd.xlane.f32.xlu0 %v76_v23 }
  0x2d   :  { %62 = vadd.xlane.f32.xlu1 %v61_v26  ;;  %59 = vadd.xlane.f32.xlu0 %v58_v27 }
  0x31   :  { %86 = vadd.xlane.f32.xlu1 %v85_v30  ;;  %83 = vadd.xlane.f32.xlu0 %v82_v31 }
  0xa2   :  { %v48_v32 = vpop.xlane.xlu1 %47  ;;  %v42_v33 = vpop.xlane.xlu0 %41 }
  0xa3   :  { %v120_v54 = vrot.slane %v48_v32, %v108_v47  ;;  %v109_v55 = vrot.slane %v42_v33, %v108_v47 }
  0xa6   :  { %v51_v34 = vpop.xlane.xlu1 %50  ;;  %v45_v35 = vpop.xlane.xlu0 %44 }
  0xa7   :  { %v124_v48 = vrot.slane %v51_v34, %v113_v44  ;;  %v114_v49 = vrot.slane %v45_v35, %v113_v44 }
  0xa9   :  { %v125_v56 = vsel %vm115_vm1, %v124_v48, %v120_v54  ;;  %v116_v57 = vsel %vm115_vm1, %v114_v49, %v109_v55 }
  0xaa   :  { %v69_v37 = vpop.xlane.xlu1 %68  ;;  %v66_v38 = vpop.xlane.xlu0 %65  ;;  %v181_v5 = vsel %vm180_vm2, %v125_v56, %v116_v57 }
  0xab   :  { %v151_v1 = vrot.slane %v69_v37, %v113_v44  ;;  %v147_v2 = vrot.slane %v66_v38, %v108_v47 }
  0xad   :  { %v152_v13 = vsel %vm115_vm1, %v151_v1, %v147_v2 }
  0xae   :  { %v75_v41 = vpop.xlane.xlu1 %74  ;;  %v72_v42 = vpop.xlane.xlu0 %71 }
  0xaf   :  { %v160_v58 = vrot.slane %v75_v41, %v113_v44  ;;  %v156_v59 = vrot.slane %v72_v42, %v108_v47 }
  0xb1   :  { %v161_v6 = vsel %vm115_vm1, %v160_v58, %v156_v59 }
  0xb2   :  { %v57_v45 = vpop.xlane.xlu1 %56  ;;  %v54_v46 = vpop.xlane.xlu0 %53  ;;  %v186_v17 = vsel %vm180_vm2, %v161_v6, %v152_v13 }
  0xb3   :  { %v133_v50 = vrot.slane %v57_v45, %v113_v44  ;;  %v129_v51 = vrot.slane %v54_v46, %v108_v47 }
  0xb5   :  { %v134_v60 = vsel %vm115_vm1, %v133_v50, %v129_v51 }
  0xb6   :  { %v81_v52 = vpop.xlane.xlu1 %80  ;;  %v78_v53 = vpop.xlane.xlu0 %77  ;;  %v183_v8 = vsel %vm182_vm3, %v134_v60, %v181_v5 }
  0xb7   :  { %v169_v61 = vrot.slane %v81_v52, %v113_v44  ;;  %v165_v62 = vrot.slane %v78_v53, %v108_v47 }
  0xb9   :  { %v170_v9 = vsel %vm115_vm1, %v169_v61, %v165_v62 }
  0xba   :  { %v63_v63 = vpop.xlane.xlu1 %62  ;;  %v60_v0 = vpop.xlane.xlu0 %59  ;;  %v187_v19 = vsel %vm182_vm3, %v170_v9, %v186_v17 }
  0xbb   :  { %v142_v3 = vrot.slane %v63_v63, %v113_v44  ;;  %v138_v4 = vrot.slane %v60_v0, %v108_v47 }
  0xbd   :  { %v143_v7 = vsel %vm115_vm1, %v142_v3, %v138_v4 }
  0xbe   :  { %v87_v10 = vpop.xlane.xlu1 %86  ;;  %v84_v11 = vpop.xlane.xlu0 %83  ;;  %v185_v12 = vsel %vm184_vm4, %v143_v7, %v183_v8 }
  0xbf   :  { %v178_v14 = vrot.slane %v87_v10, %v113_v44  ;;  %v174_v15 = vrot.slane %v84_v11, %v108_v47  ;;  %v192_v16 = vsel %vm191_vm5, %v185_v12, -inf }
  0xc0   :  { %193 = vmax.xlane.f32.xlu0 %v192_v16 }
  0xc1   :  { %v179_v18 = vsel %vm115_vm1, %v178_v14, %v174_v15 }
  0xc2   :  { %v188_v20 = vsel %vm184_vm4, %v179_v18, %v187_v19 }
  0xc3   :  { %v195_v21 = vsel %vm191_vm5, %v188_v20, -inf }
  0xc4   :  { %196 = vmax.xlane.f32.xlu1 %v195_v21 }
 0x14d   :  { %v194_v22 = vpop.xlane.xlu0 %193 }
 0x14e   :  { %v198_v23 = vmul.f32 0.0625, %v194_v22 }
 0x150   :  { %v205_v26 = vrot.slane %v198_v23, %v108_v47 }
 0x151   :  { %v197_v24 = vpop.xlane.xlu1 %196 }
 0x152   :  { %v199_v25 = vmul.f32 0.0625, %v197_v24 }
 0x154   :  { %v209_v27 = vrot.slane %v199_v25, %v108_v47 }
 0x156   :  { %v210_v28 = vsel %vm180_vm2, %v209_v27, %v205_v26 }
 0x157   :  { %213 = vst.msk [vmem:[#allocation5] sm:$0x3] %vm212_vm6, %v210_v28 }
 0x158   :  { %266 = shalt.err (!%p263_p12)
}
 0x159   :  { %s267_s24 = scalar_lea.hbm %s353_s1, 32 }
 0x15a   :  { %p268_p13 = scmp.ne.s32.totalorder %s353_s1, %s267_s24  ;;  %p271_p0 = scmp.lt.u32.totalorder %s267_s24, %s353_s1 }
 0x15c   :  { %p273_p1 = pnand %p271_p0, %p268_p13 }
 0x15e   :  { %276 = shalt.err (!%p273_p1)
}
 0x15f   :  { %223 = dma.vmem_to_hbm [thread:$0]  %s221_s20, 32, %s353_s1, [#allocation4]  }
 0x160   :  { %279 = dma.done.wait [#allocation4], 32  }
 0x161   :  { %280 = vsyncadd [#allocation4], 4294967264 }
 0x162   :  { %227 = vsyncpa [#allocation3], 1 }
 0x163   :  { %228 = vsyncpa [#allocation4], 1 }

</bundles_post_ra>
